<compile_context>
chip_gen: v6e
topology: v6e:2x2x1
jax: 0.10.0
libtpu: 0.0.40
codegen_flags: <defaults>
</compile_context>

<pallas_src>
from typing import NamedTuple

import jax
import jax.numpy as jnp
from jax import lax
from jax.experimental import pallas as pl
from jax.experimental.pallas import tpu as pltpu


def _cdiv(a, b):
    return (a + b - 1) // b


def _round_up(n, m):
    return ((n + m - 1) // m) * m


# ---------------------------------------------------------------------------
# Kernel: one (TB, TC) output tile, accumulated over the K (feature) grid axis.
# ---------------------------------------------------------------------------
def _lin_kernel(x_ref, w_ref, b_ref, o_ref, acc_ref):
    k = pl.program_id(2)

    @pl.when(k == 0)
    def _init():
        acc_ref[...] = jnp.zeros_like(acc_ref)

    # x_ref: (TB, TK); w_ref: (TK, TC) -- weight is pre-transposed to the
    # native MXU RHS layout, so the contraction is ((1,),(0,)) with no
    # in-kernel transpose.  Accumulate in f32 regardless of input dtype.
    acc_ref[...] += lax.dot_general(
        x_ref[...],
        w_ref[...],
        dimension_numbers=(((1,), (0,)), ((), ())),
        preferred_element_type=jnp.float32,
    )

    @pl.when(k == pl.num_programs(2) - 1)
    def _finalize():
        o_ref[...] = (acc_ref[...] + b_ref[...]).astype(o_ref.dtype)


# ---------------------------------------------------------------------------
# One-time parameter packing (hoisted out of the per-call path).
# ---------------------------------------------------------------------------
class PackedLinParams(NamedTuple):
    w_fc: jax.Array    # (F_pad, C_pad): feature dim on sublanes, class dim lane-dense
    b_1c: jax.Array    # (1, C_pad), float32
    n_feature: int
    n_class: int


def prepare_lin_params(weight, bias, *, compute_dtype=None, block_k=512):
    """Pack nn.Linear params once (pad + pre-transpose + optional bf16 cast).

    weight: (nClass, nFeature) in PyTorch layout; bias: (nClass,).
    compute_dtype=jnp.bfloat16 selects the full-rate MXU path (accumulation and
    bias add stay f32); None keeps the weight dtype (exact f32 semantics).
    """
    C, F = weight.shape
    C_pad = max(128, _round_up(C, 128))          # lane-dense class dim
    if F <= block_k:
        F_pad = F                                # single K step, full extent
    else:
        F_pad = _round_up(F, _round_up(block_k, 128))

    w = weight.astype(compute_dtype) if compute_dtype is not None else weight
    w_fc = jnp.zeros((F_pad, C_pad), dtype=w.dtype).at[:F, :C].set(w.T)
    b_1c = jnp.zeros((1, C_pad), dtype=jnp.float32).at[0, :C].set(
        bias.astype(jnp.float32))
    return PackedLinParams(w_fc=w_fc, b_1c=b_1c, n_feature=F, n_class=C)


# ---------------------------------------------------------------------------
# Forward pass.
# ---------------------------------------------------------------------------
def lin_forward(x, params, *, block_b=256, block_k=512, block_c=256):
    """x: (B, nFeature) -> (B, nClass), equivalent to x @ W^T + b."""
    B, F = x.shape
    assert F == params.n_feature, (F, params.n_feature)
    F_pad, C_pad = params.w_fc.shape
    compute_dtype = params.w_fc.dtype
    out_dtype = x.dtype

    # --- K (feature) tile ----------------------------------------------------
    if F_pad <= block_k:
        TK = F_pad                                   # single K step
    else:
        TK = _round_up(min(block_k, F_pad), 128)
        if F_pad % TK:                               # block_k mismatch vs. prep
            TK = 128 if F_pad % 128 == 0 else F_pad
    n_k = F_pad // TK

    # --- N (class) tile: prefer 256-wide (full-width v6e/v7x MXU) -------------
    block_c = max(128, _round_up(block_c, 128))
    if C_pad <= block_c:
        TC = C_pad
    elif C_pad % block_c == 0:
        TC = block_c
    else:
        TC = 256 if (block_c >= 256 and C_pad % 256 == 0) else 128
    n_c = C_pad // TC

    # --- batch tile: balanced, sublane-aligned, >=2 steps for v7x megacore ----
    sublane = 16 if compute_dtype == jnp.bfloat16 else 8
    n_b = _cdiv(B, max(block_b, sublane))
    if n_b == 1 and B > 4 * sublane:
        n_b = 2                                      # keep both v7x TCs busy
    TB = _round_up(_cdiv(B, n_b), sublane)
    B_pad = n_b * TB

    # --- pad / cast activations (params were packed once, outside this path) --
    x_c = x.astype(compute_dtype) if x.dtype != compute_dtype else x
    if B_pad != B or F_pad != F:
        x_c = jnp.pad(x_c, ((0, B_pad - B), (0, F_pad - F)))

    # --- VMEM budget (v5e default scoped limit is only 16 MiB) ----------------
    isz = jnp.dtype(compute_dtype).itemsize
    tile_bytes = (2 * TB * TK * isz                                  # x (dbl-buf)
                  + 2 * TK * TC * isz                                # weight
                  + 2 * TC * 4                                       # bias
                  + 2 * TB * TC * jnp.dtype(out_dtype).itemsize      # out
                  + TB * TC * 4)                                     # f32 acc
    vmem_limit = max(int(tile_bytes * 1.5) + (4 << 20), 32 << 20)

    out_padded = pl.pallas_call(
        _lin_kernel,
        out_shape=jax.ShapeDtypeStruct((B_pad, C_pad), out_dtype),
        grid_spec=pltpu.PrefetchScalarGridSpec(
            num_scalar_prefetch=0,
            grid=(n_b, n_c, n_k),
            in_specs=[
                pl.BlockSpec((TB, TK), lambda i, j, k: (i, k)),   # x tile
                pl.BlockSpec((TK, TC), lambda i, j, k: (k, j)),   # weight (F, C)
                pl.BlockSpec((1, TC), lambda i, j, k: (0, j)),    # bias
            ],
            out_specs=pl.BlockSpec((TB, TC), lambda i, j, k: (i, j)),
            scratch_shapes=[pltpu.VMEM((TB, TC), jnp.float32)],
        ),
        compiler_params=pltpu.CompilerParams(
            dimension_semantics=("parallel", "parallel", "arbitrary"),
            vmem_limit_bytes=vmem_limit,
        ),
    )(x_c, params.w_fc, params.b_1c)

    if B_pad == B and C_pad == params.n_class:
        return out_padded
    return out_padded[:B, :params.n_class]


if __name__ == "__main__":
    # params.nFeature = 32, params.nClass = 8, batch = 4 (small synthetic shapes)
    nFeature, nClass, batch = 32, 8, 4

    key = jax.random.PRNGKey(0)
    kx, kw, kb = jax.random.split(key, 3)

    x = jax.random.normal(kx, (batch, nFeature), dtype=jnp.float32)
    # Deterministic "PyTorch-like" init (uniform in +/- 1/sqrt(nFeature))
    bound = 1.0 / (nFeature ** 0.5)
    weight = jax.random.uniform(kw, (nClass, nFeature), jnp.float32, -bound, bound)
    bias = jax.random.uniform(kb, (nClass,), jnp.float32, -bound, bound)

    ref = x @ weight.T + bias

    # f32 path (exact nn.Linear semantics)
    params_f32 = prepare_lin_params(weight, bias)
    out = lin_forward(x, params_f32)
    jax.block_until_ready(out)
    assert out.shape == (batch, nClass)
    assert jnp.allclose(out, ref, atol=1e-5, rtol=1e-5)

    # bf16 MXU path (full-rate MXU; f32 accumulation + f32 bias add)
    params_bf16 = prepare_lin_params(weight, bias, compute_dtype=jnp.bfloat16)
    out_bf16 = lin_forward(x, params_bf16)
    jax.block_until_ready(out_bf16)
    assert out_bf16.dtype == jnp.float32
    assert jnp.allclose(out_bf16, ref, atol=3e-2, rtol=3e-2)

    # Multi-tile check: exercises the batch, class and K ("arbitrary") grid
    # axes plus the f32 accumulator init/finalize path.
    B2, F2, C2 = 50, 300, 200
    k2x, k2w, k2b = jax.random.split(jax.random.PRNGKey(1), 3)
    x2 = jax.random.normal(k2x, (B2, F2), jnp.float32)
    w2 = jax.random.normal(k2w, (C2, F2), jnp.float32) * 0.05
    b2 = jax.random.normal(k2b, (C2,), jnp.float32)
    params2 = prepare_lin_params(w2, b2, block_k=128)
    out2 = lin_forward(x2, params2, block_b=16, block_k=128, block_c=128)
    jax.block_until_ready(out2)
    ref2 = x2 @ w2.T + b2
    assert out2.shape == (B2, C2)
    assert jnp.allclose(out2, ref2, atol=2e-2, rtol=2e-2)

    print("KERNEL_OK")
</pallas_src>

<mosaic_0001>
module attributes {stable_mosaic.version = 11 : i64} {
  func.func @_lin_kernel(%arg0: i32, %arg1: i32, %arg2: i32, %arg3: memref<8x32xf32, #tpu.memory_space<vmem>>, %arg4: memref<32x128xf32, #tpu.memory_space<vmem>>, %arg5: memref<1x128xf32, #tpu.memory_space<vmem>>, %arg6: memref<8x128xf32, #tpu.memory_space<vmem>>, %arg7: memref<8x128xf32, #tpu.memory_space<vmem>>) attributes {dimension_semantics = [#tpu.dimension_semantics<parallel>, #tpu.dimension_semantics<parallel>, #tpu.dimension_semantics<arbitrary>], iteration_bounds = array<i64: 1, 1, 1>, scalar_prefetch = 0 : i64, scratch_operands = 1 : i64, tpu.core_type = #tpu.core_type<tc>, window_params = [{transform_indices = @transform_0, window_bounds = array<i64: 8, 32>}, {transform_indices = @transform_1, window_bounds = array<i64: 32, 128>}, {transform_indices = @transform_2, window_bounds = array<i64: 1, 128>}, {transform_indices = @transform_3, window_bounds = array<i64: 8, 128>}]} {
    %c0_i32 = arith.constant 0 : i32
    %0 = arith.cmpi eq, %arg2, %c0_i32 : i32
    %1 = arith.extui %0 : i1 to i32
    %c0_i32_0 = arith.constant 0 : i32
    %2 = arith.cmpi ne, %1, %c0_i32_0 : i32
    scf.if %2 {
      %cst_10 = arith.constant 0.000000e+00 : f32
      %12 = vector.broadcast %cst_10 : f32 to vector<8x128xf32>
      %c0_11 = arith.constant 0 : index
      %c0_12 = arith.constant 0 : index
      %13 = vector.load %arg7[%c0_11, %c0_12] : memref<8x128xf32, #tpu.memory_space<vmem>>, vector<8x128xf32>
      tpu.vector_store %arg7[%c0_11, %c0_12], %12 {strides = array<i32>} : memref<8x128xf32, #tpu.memory_space<vmem>>, vector<8x128xf32>,
    } else {
    }
    %c0 = arith.constant 0 : index
    %c0_1 = arith.constant 0 : index
    %3 = vector.load %arg7[%c0, %c0_1] : memref<8x128xf32, #tpu.memory_space<vmem>>, vector<8x128xf32>
    %c0_2 = arith.constant 0 : index
    %c0_3 = arith.constant 0 : index
    %4 = vector.load %arg3[%c0_2, %c0_3] : memref<8x32xf32, #tpu.memory_space<vmem>>, vector<8x32xf32>
    %c0_4 = arith.constant 0 : index
    %c0_5 = arith.constant 0 : index
    %5 = vector.load %arg4[%c0_4, %c0_5] : memref<32x128xf32, #tpu.memory_space<vmem>>, vector<32x128xf32>
    %cst = arith.constant dense<0.000000e+00> : vector<8x128xf32>
    %6 = tpu.matmul %4, %5, %cst {dimension_numbers = #tpu.dot_dimension_numbers<[1], [0], [0], [1], [0, 0, 1, 1], [], []>} : vector<8x32xf32>, vector<32x128xf32>, vector<8x128xf32> -> vector<8x128xf32>
    %7 = arith.addf %3, %6 : vector<8x128xf32>
    %c0_6 = arith.constant 0 : index
    %c0_7 = arith.constant 0 : index
    %8 = vector.load %arg7[%c0_6, %c0_7] : memref<8x128xf32, #tpu.memory_space<vmem>>, vector<8x128xf32>
    tpu.vector_store %arg7[%c0_6, %c0_7], %7 {strides = array<i32>} : memref<8x128xf32, #tpu.memory_space<vmem>>, vector<8x128xf32>,
    %c0_i32_8 = arith.constant 0 : i32
    %9 = arith.cmpi eq, %arg2, %c0_i32_8 : i32
    %10 = arith.extui %9 : i1 to i32
    %c0_i32_9 = arith.constant 0 : i32
    %11 = arith.cmpi ne, %10, %c0_i32_9 : i32
    scf.if %11 {
      %c0_10 = arith.constant 0 : index
      %c0_11 = arith.constant 0 : index
      %12 = vector.load %arg7[%c0_10, %c0_11] : memref<8x128xf32, #tpu.memory_space<vmem>>, vector<8x128xf32>
      %c0_12 = arith.constant 0 : index
      %c0_13 = arith.constant 0 : index
      %13 = vector.load %arg5[%c0_12, %c0_13] : memref<1x128xf32, #tpu.memory_space<vmem>>, vector<1x128xf32>
      %14 = vector.broadcast %13 : vector<1x128xf32> to vector<8x128xf32>
      %15 = arith.addf %12, %14 : vector<8x128xf32>
      %c0_14 = arith.constant 0 : index
      %c0_15 = arith.constant 0 : index
      %16 = vector.load %arg6[%c0_14, %c0_15] : memref<8x128xf32, #tpu.memory_space<vmem>>, vector<8x128xf32>
      tpu.vector_store %arg6[%c0_14, %c0_15], %15 {strides = array<i32>} : memref<8x128xf32, #tpu.memory_space<vmem>>, vector<8x128xf32>,
    } else {
    }
    return
  }
  func.func @transform_0(%arg0: i32, %arg1: i32, %arg2: i32) -> (i32, i32) {
    %c0_i32 = arith.constant 0 : i32
    return %arg0, %arg2 : i32, i32
  }
  func.func @transform_1(%arg0: i32, %arg1: i32, %arg2: i32) -> (i32, i32) {
    %c0_i32 = arith.constant 0 : i32
    return %arg2, %arg1 : i32, i32
  }
  func.func @transform_2(%arg0: i32, %arg1: i32, %arg2: i32) -> (i32, i32) {
    %c0_i32 = arith.constant 0 : i32
    %c0_i32_0 = arith.constant 0 : i32
    return %c0_i32, %arg1 : i32, i32
  }
  func.func @transform_3(%arg0: i32, %arg1: i32, %arg2: i32) -> (i32, i32) {
    %c0_i32 = arith.constant 0 : i32
    return %arg0, %arg1 : i32, i32
  }
}

</mosaic_0001>

<bundles_post_ra>
// kernel: tpu_custom_call.1
= control target key start
LH: loop header
LB: loop body
LE: loop exit
PB: predicated region body
PF: predicated region fallthrough
CT: control target
= control target key end

     0   :  { %8 = vsyncpa [#allocation4], 0  ;;  %s287_s0 = inlined_call_operand.hbm [shape: f32[8,32], index: 0, kind: input, shape index: {}]   ;;  %s288_s1 = inlined_call_operand.hbm [shape: f32[32,128], index: 1, kind: input, shape index: {}]   ;;  %s289_s2 = inlined_call_operand.vmem [shape: f32[1,128], index: 2, kind: input, shape index: {}]   ;;  %s290_s3 = inlined_call_operand.hbm [shape: f32[8,128], index: 3, kind: output, shape index: {}]  }
   0x1   :  { %9 = vsyncpa [#allocation7], 0 }
   0x2   :  { %10 = vsyncpa [#allocation5], 0  ;;  %s248_s12 = smov [#allocation3]   ;;  %s249_s14 = smov [#allocation6]  }
   0x3   :  { %s17_s13 = sshll.u32 %s248_s12, 4  ;;  %s26_s15 = sshll.u32 %s249_s14, 4  ;;  %s18_s13 = int_to_ptr.vmem [resolvable:$true] %s17_s13  ;;  %s27_s15 = int_to_ptr.vmem [resolvable:$true] %s26_s15 }
   0x4   :  { %s190_s16 = scalar_lea.vmem %s18_s13, 128  ;;  %p195_p1 = scmp.lt.s32.totalorder %s18_s13, %s18_s13 }
   0x5   :  { %p191_p0 = scmp.ne.s32.totalorder %s18_s13, %s190_s16  ;;  %p196_p2 = scmp.lt.s32.totalorder %s190_s16, %s190_s16 }
   0x7   :  { %p197_p3 = por %p196_p2, %p195_p1 }
   0x9   :  { %p198_p4 = pnand %p197_p3, %p191_p0 }
   0xb   :  { %201 = shalt.err (!%p198_p4)
}
   0xc   :  { %20 = dma.hbm_to_vmem [thread:$0]  %s287_s0, 128, %s18_s13, [#allocation4]  }
   0xd   :  { %s210_s19 = scalar_lea.vmem %s27_s15, 512  ;;  %p215_p6 = scmp.lt.s32.totalorder %s27_s15, %s27_s15 }
   0xe   :  { %p211_p5 = scmp.ne.s32.totalorder %s27_s15, %s210_s19  ;;  %p216_p7 = scmp.lt.s32.totalorder %s210_s19, %s210_s19 }
  0x10   :  { %p217_p8 = por %p216_p7, %p215_p6 }
  0x12   :  { %p218_p9 = pnand %p217_p8, %p211_p5 }
  0x14   :  { %221 = shalt.err (!%p218_p9)
}
  0x15   :  { %s250_s20 = smov 128   ;;  %s251_s21 = smov 8  }
  0x16   :  { %32 = dma.hbm_to_vmem [thread:$0]  %s288_s1, 512, %s27_s15, [#allocation7], %s250_s20, %s250_s20, %s251_s21  }
  0x17   :  { %242 = dma.done.wait [#allocation4], 128  }
  0x18   :  { %243 = vsyncadd [#allocation4], 4294967168 }
  0x19   :  { %244 = dma.done.wait [#allocation7], 512  }
  0x1a   :  { %245 = vsyncadd [#allocation7], 4294966784  ;;  %v252_v0 = vmov 0.0   ;;  %vm253_vm0 = vmmov 0   ;;  %v51_v1 = vld [vmem:[#allocation6 + $0x18] sm:$0xff]  ;;  %v50_v2 = vld [vmem:[#allocation6 + $0x10] sm:$0xff] }
  0x1b   :  { %164 = vmatprep.subr.mxu0 %v252_v0  ;;  %172 = vmatprep.mubr.msk.f32.mxu0 %vm253_vm0, %v252_v0  ;;  %v49_v3 = vld [vmem:[#allocation6 + $0x8] sm:$0xff]  ;;  %v48_v4 = vld [vmem:[#allocation6] sm:$0xff]  ;;  %v47_v5 = vld [vmem:[#allocation3] sm:$0xff]  ;;  %vm52_vm1 = vcmask 261120   ;;  %s254_s24 = smov [#allocation8]  }
  0x1c   :  { %165 = vmatpush3.msra.mxu0 %v51_v1  ;;  %v158_v6 = vld [vmem:[%s289_s2] ss:$0 sm:$0xff]  ;;  %s147_s25 = sshll.u32 %s254_s24, 4  ;;  %s148_s25 = int_to_ptr.vmem [resolvable:$true] %s147_s25 }
  0x1d   :  { %166 = vmatprep.subr.mxu0 %v252_v0  ;;  %s222_s26 = scalar_lea.vmem %s148_s25, 128  ;;  %p227_p11 = scmp.lt.s32.totalorder %s148_s25, %s148_s25 }
  0x1e   :  { %167 = vmatpush3.msra.mxu0 %v50_v2  ;;  %p223_p10 = scmp.ne.s32.totalorder %s148_s25, %s222_s26  ;;  %p228_p12 = scmp.lt.s32.totalorder %s222_s26, %s222_s26 }
  0x1f   :  { %168 = vmatprep.subr.mxu0 %v252_v0 }
  0x20   :  { %169 = vmatpush3.msra.mxu0 %v49_v3  ;;  %p229_p13 = por %p228_p12, %p227_p11 }
  0x21   :  { %170 = vmatprep.subr.mxu0 %v252_v0 }
  0x22   :  { %171 = vmatpush3.msra.mxu0 %v48_v4  ;;  %p230_p0 = pnand %p229_p13, %p223_p10 }
  0x23   :  { %173 = vmatmul.mubr.msk.f32.vlgmr.msra.gmra.mxu0 %vm52_vm1, %v47_v5 }
  0xe3   :  { %v122_v7 = vpop.f32.mrf.mxu0 }
  0xe4   :  { %v139_v8 = vadd.f32 %v158_v6, %v122_v7 }
  0xe5   :  { %v174_v9 = vpop.f32.mrf.mxu0 }
  0xe6   :  { %140 = vst [vmem:[#allocation8] sm:$0xff] %v139_v8 }
  0xe7   :  { %233 = shalt.err (!%p230_p0)
}
  0xe8   :  { %150 = dma.vmem_to_hbm [thread:$0]  %s148_s25, 128, %s290_s3, [#allocation5]  }
  0xe9   :  { %246 = dma.done.wait [#allocation5], 128  }
  0xea   :  { %247 = vsyncadd [#allocation5], 4294967168 }
  0xeb   :  { %154 = vsyncpa [#allocation4], 1 }
  0xec   :  { %155 = vsyncpa [#allocation7], 1 }
  0xed   :  { %156 = vsyncpa [#allocation5], 1 }

</bundles_post_ra>
